<compile_context>
chip_gen: v6e
topology: v6e:2x2x1
jax: 0.10.0
libtpu: 0.0.40
codegen_flags: <defaults>
</compile_context>

<pallas_src>
import functools

import jax
import jax.numpy as jnp
from jax.experimental import pallas as pl
from jax.experimental.pallas import tpu as pltpu


# ----------------------------------------------------------------------------
# Kernel
# ----------------------------------------------------------------------------
def ffn_kernel(x_ref, w1_ref, b1_ref, w2_ref, b2_ref, out_ref, acc_ref):
    # x_ref:  (tm, tk)       bf16
    # w1_ref: (tk, HID)      bf16   (streamed / multi-buffered)
    # b1_ref: (1, HID)       f32
    # w2_ref: (HID, OUT_PAD) f32
    # b2_ref: (1, OUT_PAD)   f32    (finfo(f32).min/2 in padded columns)
    # out_ref:(tm, OUT_PAD)  f32    softmax probabilities (padded cols ~ 0)
    # acc_ref:(tm, HID)      f32    VMEM accumulator, resident across K
    k = pl.program_id(1)

    @pl.when(k == 0)
    def _():
        acc_ref[...] = jnp.zeros_like(acc_ref)

    # Streamed GEMM: bf16 inputs, f32 accumulation on the MXU.
    acc_ref[...] += jnp.dot(
        x_ref[...], w1_ref[...], preferred_element_type=jnp.float32
    )

    @pl.when(k == pl.num_programs(1) - 1)
    def _():
        # Epilogue: bias1 + ReLU, small second GEMM, bias2, stable softmax.
        h = jnp.maximum(acc_ref[...] + b1_ref[...], 0.0)
        logits = (
            jnp.dot(h, w2_ref[...], preferred_element_type=jnp.float32)
            + b2_ref[...]
        )
        m = jnp.max(logits, axis=1, keepdims=True)
        e = jnp.exp(logits - m)
        inv = pl.reciprocal(jnp.sum(e, axis=1, keepdims=True), approx=True)
        out_ref[...] = e * inv


# ----------------------------------------------------------------------------
# Static tiling helpers
# ----------------------------------------------------------------------------
def _round_up(x: int, m: int) -> int:
    return ((x + m - 1) // m) * m


def _tpu_config():
    """(tk_cap, vmem_limit_bytes) per TPU generation; conservative fallback."""
    try:
        kind = jax.devices()[0].device_kind.lower()
    except Exception:  # pragma: no cover - defensive, keeps CPU interpret OK
        kind = ""
    # v5e / v6e have 128 MiB physical VMEM: allow 32 MiB double-buffered W1.
    if ("v5 lite" in kind) or ("v5e" in kind) or ("v6" in kind):
        return 32768, 96 << 20
    # v7x (64 MiB VMEM per TensorCore) and unknown generations: keep the W1
    # double-buffer at <=16 MiB and a 48 MiB scoped-VMEM budget.
    return 16384, 48 << 20


_TK_CANDIDATES = (32768, 16384, 15360, 8192, 4096, 2048, 1024, 512, 256)


def _choose_tk(d_in: int, tk_cap: int) -> int:
    # Prefer the largest candidate <= cap that divides d_in exactly (e.g.
    # 15360 divides 3*640*480 = 921600), otherwise the largest that fits.
    for cand in _TK_CANDIDATES:
        if cand <= tk_cap and cand <= d_in and d_in % cand == 0:
            return cand
    for cand in _TK_CANDIDATES:
        if cand <= tk_cap and cand <= d_in:
            return cand
    return 256


# ----------------------------------------------------------------------------
# One-time parameter preparation (pad + cast OUTSIDE the per-call path)
# ----------------------------------------------------------------------------
def prepare_params(w1, b1, w2, b2):
    """Pad/cast parameters once. Call at model-setup time, not per forward."""
    d_in, hid = w1.shape
    out = w2.shape[1]
    tk_cap, _ = _tpu_config()
    tk = _choose_tk(d_in, tk_cap)
    d_pad = _round_up(d_in, tk)
    out_pad = _round_up(max(out, 128), 128)

    w1_p = jnp.zeros((d_pad, hid), jnp.bfloat16).at[:d_in, :].set(
        w1.astype(jnp.bfloat16)
    )
    b1_2d = b1.reshape(1, hid).astype(jnp.float32)
    w2_p = jnp.zeros((hid, out_pad), jnp.float32).at[:, :out].set(
        w2.astype(jnp.float32)
    )
    # Padded logit columns get a dtype-aware huge negative bias so softmax
    # ignores them (exp underflows to 0 in f32).
    neg_big = float(jnp.finfo(jnp.float32).min) / 2
    b2_p = jnp.full((1, out_pad), neg_big, jnp.float32).at[0, :out].set(
        b2.astype(jnp.float32)
    )
    return w1_p, b1_2d, w2_p, b2_p


# ----------------------------------------------------------------------------
# Forward pass (jitted; parameters arrive already padded/cast)
# ----------------------------------------------------------------------------
@functools.partial(jax.jit, static_argnames=("out_features",))
def feed_forward_net(x_nchw, w1_p, b1_2d, w2_p, b2_p, *, out_features):
    """x_nchw: (B, C, H, W) float32. Returns (B, out_features) probabilities."""
    B = x_nchw.shape[0]
    x_flat = x_nchw.reshape(B, -1)          # torch.nn.Flatten semantics
    d_in = x_flat.shape[1]
    d_pad, hid = w1_p.shape
    out_pad = w2_p.shape[1]

    # ---- static tiling decisions (must agree with prepare_params) ----------
    tk_cap, vmem_limit = _tpu_config()
    tk = _choose_tk(d_in, tk_cap)
    assert _round_up(d_in, tk) == d_pad, "params were prepared with a different tk"

    # bf16 packs 16 rows per sublane group -> round M to a multiple of 16.
    mb = _round_up(max(B, 16), 16)
    # One M tile whenever the batch fits 256 rows (256x256 MXU face) so W1 is
    # streamed from HBM exactly once regardless of K-step count.
    tm = mb if mb <= 256 else 256
    mb = _round_up(mb, tm)
    n_m, n_k = mb // tm, d_pad // tk

    # ---- pad & cast the (small) activation only -----------------------------
    x_p = jnp.zeros((mb, d_pad), jnp.bfloat16).at[:B, :d_in].set(
        x_flat.astype(jnp.bfloat16)
    )

    # W1 spec: deeper pipelining only when the K grid is long enough for the
    # extra buffer to matter (hides DMA-issue jitter on fast-HBM parts).
    if n_k >= 8:
        w1_spec = pl.BlockSpec(
            (tk, hid), lambda i, k: (k, 0), pipeline_mode=pl.Buffered(3)
        )
    else:
        w1_spec = pl.BlockSpec((tk, hid), lambda i, k: (k, 0))

    # Advisory cost: this is a ~W1-sized streaming custom call; telling XLA
    # lets it overlap surrounding ops instead of serializing around it.
    cost = pl.CostEstimate(
        flops=2 * mb * d_pad * hid + 2 * mb * hid * out_pad,
        transcendentals=mb * out_pad,
        bytes_accessed=(
            n_m * w1_p.size * 2      # W1 bf16, re-streamed per M tile
            + x_p.size * 2           # x bf16
            + b1_2d.size * 4 + w2_p.size * 4 + b2_p.size * 4
            + mb * out_pad * 4       # output
        ),
    )

    probs_p = pl.pallas_call(
        ffn_kernel,
        out_shape=jax.ShapeDtypeStruct((mb, out_pad), jnp.float32),
        grid_spec=pltpu.PrefetchScalarGridSpec(
            num_scalar_prefetch=0,
            grid=(n_m, n_k),
            in_specs=[
                pl.BlockSpec((tm, tk), lambda i, k: (i, k)),        # x
                w1_spec,                                            # W1 (streamed)
                pl.BlockSpec((1, hid), lambda i, k: (0, 0)),        # b1
                pl.BlockSpec((hid, out_pad), lambda i, k: (0, 0)),  # W2 (padded)
                pl.BlockSpec((1, out_pad), lambda i, k: (0, 0)),    # b2 (padded)
            ],
            out_specs=pl.BlockSpec((tm, out_pad), lambda i, k: (i, 0)),
            scratch_shapes=[pltpu.VMEM((tm, hid), jnp.float32)],
        ),
        compiler_params=pltpu.CompilerParams(
            dimension_semantics=("parallel", "arbitrary"),
            vmem_limit_bytes=vmem_limit,
        ),
        cost_estimate=cost,
    )(x_p, w1_p, b1_2d, w2_p, b2_p)

    return probs_p[:B, :out_features]


# ----------------------------------------------------------------------------
# Parameter init (mimics torch.nn.Linear defaults)
# ----------------------------------------------------------------------------
def init_params(key, d_in, hid, out):
    """U(-1/sqrt(fan_in), 1/sqrt(fan_in)) for weights and biases."""
    k1, k2, k3, k4 = jax.random.split(key, 4)
    bound1 = 1.0 / jnp.sqrt(d_in)
    bound2 = 1.0 / jnp.sqrt(hid)
    # stored as (in_features, out_features) for x @ W
    w1 = jax.random.uniform(k1, (d_in, hid), jnp.float32, -bound1, bound1)
    b1 = jax.random.uniform(k2, (hid,), jnp.float32, -bound1, bound1)
    w2 = jax.random.uniform(k3, (hid, out), jnp.float32, -bound2, bound2)
    b2 = jax.random.uniform(k4, (out,), jnp.float32, -bound2, bound2)
    return w1, b1, w2, b2


if __name__ == "__main__":
    # Small shapes consistent with the forward pass structure:
    # batch=2, channels=3, spatial=16x16 -> D_IN=768, HIDDEN=256, OUT=5
    B, C, H, W = 2, 3, 16, 16
    D_IN, HIDDEN, OUT = C * H * W, 256, 5

    key = jax.random.PRNGKey(0)
    kx, kp = jax.random.split(key)
    x = jax.random.normal(kx, (B, C, H, W), dtype=jnp.float32)
    w1, b1, w2, b2 = init_params(kp, D_IN, HIDDEN, OUT)

    # One-time prep (pad + bf16 cast of W1 happens here, not per call).
    w1_p, b1_2d, w2_p, b2_p = prepare_params(w1, b1, w2, b2)

    probs = feed_forward_net(x, w1_p, b1_2d, w2_p, b2_p, out_features=OUT)
    probs = jax.block_until_ready(probs)

    # Reference in plain JAX, matching the kernel's bf16 streaming of the
    # first GEMM (f32 accumulation); rest in f32.
    x_bf = x.reshape(B, -1).astype(jnp.bfloat16)
    w1_bf = w1.astype(jnp.bfloat16)
    ref_h = jnp.maximum(
        jnp.dot(x_bf, w1_bf, preferred_element_type=jnp.float32) + b1, 0.0
    )
    ref_logits = ref_h @ w2 + b2
    ref = jax.nn.softmax(ref_logits, axis=1)

    assert probs.shape == (B, OUT)
    assert jnp.allclose(probs, ref, atol=2e-3, rtol=2e-3)
    assert jnp.allclose(jnp.sum(probs, axis=1), 1.0, atol=2e-3)

    print("KERNEL_OK")
</pallas_src>

<mosaic_0001>
module attributes {stable_mosaic.version = 11 : i64} {
  func.func @ffn_kernel(%arg0: i32, %arg1: i32, %arg2: memref<16x256xbf16, #tpu.memory_space<vmem>>, %arg3: memref<256x256xbf16, #tpu.memory_space<vmem>>, %arg4: memref<1x256xf32, #tpu.memory_space<vmem>>, %arg5: memref<256x128xf32, #tpu.memory_space<vmem>>, %arg6: memref<1x128xf32, #tpu.memory_space<vmem>>, %arg7: memref<16x128xf32, #tpu.memory_space<vmem>>, %arg8: memref<16x256xf32, #tpu.memory_space<vmem>>) attributes {dimension_semantics = [#tpu.dimension_semantics<parallel>, #tpu.dimension_semantics<arbitrary>], iteration_bounds = array<i64: 1, 3>, scalar_prefetch = 0 : i64, scratch_operands = 1 : i64, tpu.core_type = #tpu.core_type<tc>, window_params = [{transform_indices = @transform_0, window_bounds = array<i64: 16, 256>}, {transform_indices = @transform_1, window_bounds = array<i64: 256, 256>}, {pipeline_mode = #tpu.pipeline_mode<synchronous>, transform_indices = @transform_2, window_bounds = array<i64: 1, 256>}, {pipeline_mode = #tpu.pipeline_mode<synchronous>, transform_indices = @transform_3, window_bounds = array<i64: 256, 128>}, {pipeline_mode = #tpu.pipeline_mode<synchronous>, transform_indices = @transform_4, window_bounds = array<i64: 1, 128>}, {transform_indices = @transform_5, window_bounds = array<i64: 16, 128>}]} {
    %c0_i32 = arith.constant 0 : i32
    %0 = arith.cmpi eq, %arg1, %c0_i32 : i32
    %1 = arith.extui %0 : i1 to i32
    %c0_i32_0 = arith.constant 0 : i32
    %2 = arith.cmpi ne, %1, %c0_i32_0 : i32
    scf.if %2 {
      %cst_9 = arith.constant 0.000000e+00 : f32
      %12 = vector.broadcast %cst_9 : f32 to vector<16x256xf32>
      %c0_10 = arith.constant 0 : index
      %c0_11 = arith.constant 0 : index
      %13 = vector.load %arg8[%c0_10, %c0_11] : memref<16x256xf32, #tpu.memory_space<vmem>>, vector<16x256xf32>
      tpu.vector_store %arg8[%c0_10, %c0_11], %12 {strides = array<i32>} : memref<16x256xf32, #tpu.memory_space<vmem>>, vector<16x256xf32>,
    } else {
    }
    %c0 = arith.constant 0 : index
    %c0_1 = arith.constant 0 : index
    %3 = vector.load %arg8[%c0, %c0_1] : memref<16x256xf32, #tpu.memory_space<vmem>>, vector<16x256xf32>
    %c0_2 = arith.constant 0 : index
    %c0_3 = arith.constant 0 : index
    %4 = vector.load %arg2[%c0_2, %c0_3] : memref<16x256xbf16, #tpu.memory_space<vmem>>, vector<16x256xbf16>
    %c0_4 = arith.constant 0 : index
    %c0_5 = arith.constant 0 : index
    %5 = vector.load %arg3[%c0_4, %c0_5] : memref<256x256xbf16, #tpu.memory_space<vmem>>, vector<256x256xbf16>
    %cst = arith.constant dense<0.000000e+00> : vector<16x256xf32>
    %6 = tpu.matmul %4, %5, %cst {dimension_numbers = #tpu.dot_dimension_numbers<[1], [0], [0], [1], [0, 0, 1, 1], [], []>} : vector<16x256xbf16>, vector<256x256xbf16>, vector<16x256xf32> -> vector<16x256xf32>
    %7 = arith.addf %3, %6 : vector<16x256xf32>
    %c0_6 = arith.constant 0 : index
    %c0_7 = arith.constant 0 : index
    %8 = vector.load %arg8[%c0_6, %c0_7] : memref<16x256xf32, #tpu.memory_space<vmem>>, vector<16x256xf32>
    tpu.vector_store %arg8[%c0_6, %c0_7], %7 {strides = array<i32>} : memref<16x256xf32, #tpu.memory_space<vmem>>, vector<16x256xf32>,
    %c2_i32 = arith.constant 2 : i32
    %9 = arith.cmpi eq, %arg1, %c2_i32 : i32
    %10 = arith.extui %9 : i1 to i32
    %c0_i32_8 = arith.constant 0 : i32
    %11 = arith.cmpi ne, %10, %c0_i32_8 : i32
    scf.if %11 {
      %c0_9 = arith.constant 0 : index
      %c0_10 = arith.constant 0 : index
      %12 = vector.load %arg8[%c0_9, %c0_10] : memref<16x256xf32, #tpu.memory_space<vmem>>, vector<16x256xf32>
      %c0_11 = arith.constant 0 : index
      %c0_12 = arith.constant 0 : index
      %13 = vector.load %arg4[%c0_11, %c0_12] : memref<1x256xf32, #tpu.memory_space<vmem>>, vector<1x256xf32>
      %14 = vector.broadcast %13 : vector<1x256xf32> to vector<16x256xf32>
      %15 = arith.addf %12, %14 : vector<16x256xf32>
      %cst_13 = arith.constant 0.000000e+00 : f32
      %16 = vector.broadcast %cst_13 : f32 to vector<16x256xf32>
      %17 = arith.maximumf %15, %16 : vector<16x256xf32>
      %c0_14 = arith.constant 0 : index
      %c0_15 = arith.constant 0 : index
      %18 = vector.load %arg5[%c0_14, %c0_15] : memref<256x128xf32, #tpu.memory_space<vmem>>, vector<256x128xf32>
      %cst_16 = arith.constant dense<0.000000e+00> : vector<16x128xf32>
      %19 = tpu.matmul %17, %18, %cst_16 {dimension_numbers = #tpu.dot_dimension_numbers<[1], [0], [0], [1], [0, 0, 1, 1], [], []>} : vector<16x256xf32>, vector<256x128xf32>, vector<16x128xf32> -> vector<16x128xf32>
      %c0_17 = arith.constant 0 : index
      %c0_18 = arith.constant 0 : index
      %20 = vector.load %arg6[%c0_17, %c0_18] : memref<1x128xf32, #tpu.memory_space<vmem>>, vector<1x128xf32>
      %21 = vector.broadcast %20 : vector<1x128xf32> to vector<16x128xf32>
      %22 = arith.addf %19, %21 : vector<16x128xf32>
      %cst_19 = arith.constant dense<0xFF800000> : vector<16xf32>
      %23 = vector.multi_reduction <maximumf>, %22, %cst_19 [1] : vector<16x128xf32> to vector<16xf32>
      %24 = vector.shape_cast %23 : vector<16xf32> to vector<16x1xf32>
      %25 = vector.broadcast %24 : vector<16x1xf32> to vector<16x128xf32>
      %26 = arith.subf %22, %25 : vector<16x128xf32>
      %27 = math.exp %26 : vector<16x128xf32>
      %cst_20 = arith.constant dense<0.000000e+00> : vector<16xf32>
      %28 = vector.multi_reduction <add>, %27, %cst_20 [1] : vector<16x128xf32> to vector<16xf32>
      %29 = vector.shape_cast %28 : vector<16xf32> to vector<16x1xf32>
      %30 = tpu.reciprocal %29 {approx = true} : vector<16x1xf32> -> vector<16x1xf32>
      %31 = vector.broadcast %30 : vector<16x1xf32> to vector<16x128xf32>
      %32 = arith.mulf %27, %31 : vector<16x128xf32>
      %c0_21 = arith.constant 0 : index
      %c0_22 = arith.constant 0 : index
      %33 = vector.load %arg7[%c0_21, %c0_22] : memref<16x128xf32, #tpu.memory_space<vmem>>, vector<16x128xf32>
      tpu.vector_store %arg7[%c0_21, %c0_22], %32 {strides = array<i32>} : memref<16x128xf32, #tpu.memory_space<vmem>>, vector<16x128xf32>,
    } else {
    }
    return
  }
  func.func @transform_0(%arg0: i32, %arg1: i32) -> (i32, i32) {
    %c0_i32 = arith.constant 0 : i32
    return %arg0, %arg1 : i32, i32
  }
  func.func @transform_1(%arg0: i32, %arg1: i32) -> (i32, i32) {
    %c0_i32 = arith.constant 0 : i32
    %c0_i32_0 = arith.constant 0 : i32
    return %arg1, %c0_i32 : i32, i32
  }
  func.func @transform_2(%arg0: i32, %arg1: i32) -> (i32, i32) {
    %c0_i32 = arith.constant 0 : i32
    %c0_i32_0 = arith.constant 0 : i32
    %c0_i32_1 = arith.constant 0 : i32
    return %c0_i32, %c0_i32_0 : i32, i32
  }
  func.func @transform_3(%arg0: i32, %arg1: i32) -> (i32, i32) {
    %c0_i32 = arith.constant 0 : i32
    %c0_i32_0 = arith.constant 0 : i32
    %c0_i32_1 = arith.constant 0 : i32
    return %c0_i32, %c0_i32_0 : i32, i32
  }
  func.func @transform_4(%arg0: i32, %arg1: i32) -> (i32, i32) {
    %c0_i32 = arith.constant 0 : i32
    %c0_i32_0 = arith.constant 0 : i32
    %c0_i32_1 = arith.constant 0 : i32
    return %c0_i32, %c0_i32_0 : i32, i32
  }
  func.func @transform_5(%arg0: i32, %arg1: i32) -> (i32, i32) {
    %c0_i32 = arith.constant 0 : i32
    %c0_i32_0 = arith.constant 0 : i32
    return %arg0, %c0_i32 : i32, i32
  }
}

</mosaic_0001>

<bundles_post_ra>
// kernel: feed_forward_net.1
= control target key start
LH: loop header
LB: loop body
LE: loop exit
PB: predicated region body
PF: predicated region fallthrough
CT: control target
= control target key end

     0   :  { %10 = vsyncpa [#allocation5], 0  ;;  %s1441_s0 = inlined_call_operand.vmem [shape: bf16[16,768], index: 0, kind: input, shape index: {}]   ;;  %s1442_s1 = inlined_call_operand.hbm [shape: bf16[768,256], index: 1, kind: input, shape index: {}]   ;;  %s1443_s2 = inlined_call_operand.vmem [shape: f32[1,256], index: 2, kind: input, shape index: {}]   ;;  %s1444_s3 = inlined_call_operand.vmem [shape: f32[256,128], index: 3, kind: input, shape index: {}]   ;;  %s1445_s4 = inlined_call_operand.vmem [shape: f32[1,128], index: 4, kind: input, shape index: {}]   ;;  %s1446_s5 = inlined_call_operand.vmem [shape: f32[16,128], index: 5, kind: output, shape index: {}]  }
   0x1   :  { %12 = vsyncpa [#allocation5 + $0x1], 0  ;;  %s1201_s18 = smov 0   ;;  %s1203_s19 = smov 0  }
   0x2   :  { %s1205_s20 = smov 0   ;;  %s1207_s21 = smov 0  }
   0x3   :  { %s1209_s22 = smov 0   ;;  %s1211_s23 = smov 0  }
   0x4 LB: > { %s850_s24 = sadd.s32 4294967295, %s1165_s23   ;;  %s27_s25 = sadd.s32 1, %s1161_s22  ;;  %s1165_s23 = sphi %s1211_s23, %s18_s23   ;;  %s1161_s22 = sphi %s1209_s22, %s1453_s22   ;;  %s1157_s21 = sphi %s1207_s21, %s1452_s21   ;;  %s1153_s20 = sphi %s1205_s20, %s1451_s20   ;;  %s1149_s19 = sphi %s1203_s19, %s1450_s19   ;;  %s1145_s18 = sphi %s1201_s18, %s1449_s18  }
   0x5   : > { %p28_p0 = scmp.ge.s32.totalorder %s27_s25, 3  ;;  %s39_s26 = sadd.s32 1, %s1153_s20 }
   0x6   : > { %p46_p1 = scmp.ne.s32.totalorder %s1153_s20, %s1149_s19  ;;  %p47_p2 = scmp.eq.s32.totalorder %s1165_s23, 0 }
   0x7   : > { %s1455_s25 = smov (%p28_p0, %s27_s25), 0  ;;  %p78_p4 = scmp.ne.s32.totalorder %s1149_s19, %s1145_s18 }
   0x8   : > { %p1237_p3 = por %p47_p2, %p46_p1  ;;  %s35_s28 = ssub.s32 %s1161_s22, %s1455_s25 }
   0x9   : > { %p79_p5 = scmp.eq.s32.totalorder %s850_s24, 0  ;;  %p37_p6 = scmp.eq.s32.totalorder %s35_s28, 0 }
   0xa   : > { %p852_p8 = scmp.ge.s32.totalorder %s1165_s23, 3 }
   0xb   : > { %p1244_p7 = por %p79_p5, %p78_p4 }
   0xc   : > { %s1249_s30 = scalar_select %p37_p6, %s1153_s20, %s39_s26  }
   0xd   : > { %196 = sbr.rel (%p852_p8) target bundleno = 39 (0x27), region = 28 }
  0x12   : > { %199 = sbr.rel (!%p1237_p3) target bundleno = 23 (0x17), region = 32  ;;  %s201_s6 = sand.u32 (%p1237_p3), 1, %s1153_s20  }
  0x13   : > { %s904_s7 = sshll.u32 (%p1237_p3), %s1161_s22, 3  ;;  %s853_s8 = sshll.u32 (%p1237_p3), %s201_s6, 4 }
  0x14   : > { %s209_s11 = scalar_lea.vmem (%p1237_p3), %s1441_s0, %s904_s7  ;;  %s203_s12 = scalar_lea.vmem (%p1237_p3), [#allocation3], %s853_s8 }
  0x15   : > { %v240_v0 = vld [vmem:[%s209_s11] sm:$0xff] (%p1237_p3)  ;;  %v242_v1 = vld [vmem:[%s209_s11 + $0x18] sm:$0xff] (%p1237_p3) }
  0x16   : > { %241 = vst [vmem:[%s203_s12] sm:$0xff] (%p1237_p3), %v240_v0  ;;  %243 = vst [vmem:[%s203_s12 + $0x8] sm:$0xff] (%p1237_p3), %v242_v1 }
  0x17 PF: > { %s250_s13 = sand.u32 1, %s1153_s20   ;;  %s906_s14 = sshll.u32 %s1161_s22, 12 }
  0x18   : > { %s856_s15 = sshll.u32 %s250_s13, 8  ;;  %s261_s18 = scalar_lea.hbm %s1442_s1, %s906_s14 }
  0x19   : > { %s254_s24 = scalar_lea.vmem [#allocation4], %s856_s15  ;;  %s251_s28 = scalar_lea.sflag [#allocation5], %s250_s13 }
  0x1a   : > { %s262_s26 = sshll.u32 %s254_s24, 4  ;;  %s1167_s7 = smov [#allocation4]   ;;  %s263_s26 = int_to_ptr.vmem [resolvable:$true] %s262_s26 }
  0x1b   : > { %s1101_s6 = scalar_lea.vmem %s263_s26, 4096  ;;  %s1105_s8 = sshll.u32 %s1167_s7, 4  ;;  %s1106_s8 = int_to_ptr.vmem [resolvable:$false] %s1105_s8 }
  0x1c   : > { %p1102_p9 = scmp.ne.s32.totalorder %s263_s26, %s1101_s6  ;;  %s1107_s9 = scalar_lea.vmem %s1106_s8, 8192 }
  0x1d   : > { %p1108_p12 = scmp.lt.s32.totalorder %s263_s26, %s1106_s8  ;;  %p1109_p13 = scmp.lt.s32.totalorder %s1107_s9, %s1101_s6 }
  0x1e   : > { %p1103_p10 = pnand %p1102_p9, %p1237_p3 }
  0x1f   : > { %p1110_p0 = por %p1109_p13, %p1108_p12 }
  0x20   : > { %p1104_p11 = pneg %p1103_p10 }
  0x22   : > { %p1111_p1 = pnand %p1110_p0, %p1104_p11 }
  0x24   : > { %1114 = shalt.err (!%p1111_p1)
}
  0x25   : > { %s1168_s10 = smov 128   ;;  %s1169_s11 = smov 8  }
  0x26   : > { %977 = dma.hbm_to_vmem [thread:$0]  (%p1237_p3), %s261_s18, 4096, %s263_s26, %s251_s28, %s1168_s10, %s1168_s10, %s1169_s11  }
  0x27 PF: > { %p860_p2 = scmp.ge.s32.totalorder %s1165_s23, 1  ;;  %p270_p4 = scmp.lt.s32.totalorder %s1165_s23, 4 }
  0x29   : > { %p271_p5 = pnand %p860_p2, %p270_p4 }
  0x2a   : > { %s277_s12 = sand.u32 (!%p271_p5), 1, %s1149_s19  }
  0x2b   : > { %274 = sbr.rel (%p271_p5) target bundleno = 873 (0x369), region = 74  ;;  %s861_s13 = sshll.u32 (!%p271_p5), %s277_s12, 4 }
  0x2c   : > { %s862_s14 = sshll.u32 (!%p271_p5), %s277_s12, 8  ;;  %s1271_s15 = scalar_lea.vmem (!%p271_p5), [#allocation3], %s861_s13 }
  0x2d   : > { %s284_s16 = scalar_lea.sflag (!%p271_p5), [#allocation5], %s277_s12  ;;  %s1273_s17 = scalar_lea.vmem (!%p271_p5), [#allocation4], %s862_s14 }
  0x30   : > { %1140 = dma.done.wait (%p1244_p7), %s284_s16, 4096  }
  0x31   : > { %1142 = vsyncadd (%p1244_p7), %s284_s16, 4294963200  ;;  %p863_p3 = scmp.ne.s32.totalorder %s1157_s21, 0 }
  0x33   : > { %330 = sbr.rel (%p863_p3) target bundleno = 59 (0x3b), region = 86 }
  0x38   : > { %v1170_v2 = vmov 0.0  }
  0x39   : > { %331 = vst [vmem:[#allocation2 + $0x10] sm:$0xff] %v1170_v2  ;;  %332 = vst [vmem:[#allocation2] sm:$0xff] %v1170_v2 }
  0x3a   : > { %333 = vst [vmem:[#allocation2 + $0x18] sm:$0xff] %v1170_v2  ;;  %334 = vst [vmem:[#allocation2 + $0x8] sm:$0xff] %v1170_v2 }
  0x3b PF: > { %v1030_v3 = vld [vmem:[%s1273_s17 + $0x74] ss:$8 sps:$4 sm:$0xff]   ;;  %v1032_v4 = vld [vmem:[%s1273_s17 + $0x70] ss:$8 sps:$4 sm:$0xff]   ;;  %v1033_v5 = vld [vmem:[%s1273_s17 + $0x64] ss:$8 sps:$4 sm:$0xff]  }
  0x3c   : > { %543 = vmatprep.subr.bf16.mxu0 %v1030_v3  ;;  %v1035_v6 = vld [vmem:[%s1273_s17 + $0x60] ss:$8 sps:$4 sm:$0xff]   ;;  %v1036_v7 = vld [vmem:[%s1273_s17 + $0x54] ss:$8 sps:$4 sm:$0xff]   ;;  %v1038_v8 = vld [vmem:[%s1273_s17 + $0x50] ss:$8 sps:$4 sm:$0xff]  }
  0x3d   : > { %544 = vmatpush1.bf16.msra.mxu0 %v1032_v4  ;;  %v1039_v9 = vld [vmem:[%s1273_s17 + $0x44] ss:$8 sps:$4 sm:$0xff]   ;;  %v1041_v10 = vld [vmem:[%s1273_s17 + $0x40] ss:$8 sps:$4 sm:$0xff]   ;;  %v1042_v11 = vld [vmem:[%s1273_s17 + $0x34] ss:$8 sps:$4 sm:$0xff]  }
  0x3e   : > { %545 = vmatprep.subr.bf16.mxu0 %v1033_v5  ;;  %v1044_v12 = vld [vmem:[%s1273_s17 + $0x30] ss:$8 sps:$4 sm:$0xff]   ;;  %v1045_v13 = vld [vmem:[%s1273_s17 + $0x24] ss:$8 sps:$4 sm:$0xff]   ;;  %v1047_v14 = vld [vmem:[%s1273_s17 + $0x20] ss:$8 sps:$4 sm:$0xff]  }
  0x3f   : > { %v1048_v15 = vld [vmem:[%s1273_s17 + $0x14] ss:$8 sps:$4 sm:$0xff]   ;;  %v1050_v17 = vld [vmem:[%s1273_s17 + $0x10] ss:$8 sps:$4 sm:$0xff]   ;;  %v1051_v18 = vld [vmem:[%s1273_s17 + $0x4] ss:$8 sps:$4 sm:$0xff]  }
  0x40   : > { %v1080_v16 = vld [vmem:[%s1271_s15 + $0x4] ss:$8 sps:$4 sm:$0xff]   ;;  %v1053_v19 = vld [vmem:[%s1273_s17] ss:$8 sps:$4 sm:$0xff]   ;;  %v1056_v21 = vld [vmem:[%s1273_s17 + $0xf0] ss:$8 sps:$4 sm:$0xff]  }
  0x41   : > { %546 = vmatpush1.bf16.msra.mxu0 %v1035_v6  ;;  %575 = vmatprep.mubr.bf16.mxu0 %v1080_v16  ;;  %v1054_v20 = vld [vmem:[%s1273_s17 + $0xf4] ss:$8 sps:$4 sm:$0xff]   ;;  %v1057_v22 = vld [vmem:[%s1273_s17 + $0xe4] ss:$8 sps:$4 sm:$0xff]   ;;  %v1059_v23 = vld [vmem:[%s1273_s17 + $0xe0] ss:$8 sps:$4 sm:$0xff]  }
  0x42   : > { %547 = vmatprep.subr.bf16.mxu0 %v1036_v7  ;;  %v1060_v24 = vld [vmem:[%s1273_s17 + $0xd4] ss:$8 sps:$4 sm:$0xff]   ;;  %v1062_v25 = vld [vmem:[%s1273_s17 + $0xd0] ss:$8 sps:$4 sm:$0xff]   ;;  %v1063_v26 = vld [vmem:[%s1273_s17 + $0xc4] ss:$8 sps:$4 sm:$0xff]  }
  0x43   : > { %v1065_v27 = vld [vmem:[%s1273_s17 + $0xc0] ss:$8 sps:$4 sm:$0xff]   ;;  %v1066_v28 = vld [vmem:[%s1273_s17 + $0xb4] ss:$8 sps:$4 sm:$0xff]   ;;  %v1068_v29 = vld [vmem:[%s1273_s17 + $0xb0] ss:$8 sps:$4 sm:$0xff]  }
  0x44   : > { %v1069_v30 = vld [vmem:[%s1273_s17 + $0xa4] ss:$8 sps:$4 sm:$0xff]   ;;  %v1071_v31 = vld [vmem:[%s1273_s17 + $0xa0] ss:$8 sps:$4 sm:$0xff]   ;;  %v1072_v32 = vld [vmem:[%s1273_s17 + $0x94] ss:$8 sps:$4 sm:$0xff]  }
  0x45   : > { %548 = vmatpush1.bf16.msra.mxu0 %v1038_v8  ;;  %v1074_v33 = vld [vmem:[%s1273_s17 + $0x90] ss:$8 sps:$4 sm:$0xff]   ;;  %v1075_v34 = vld [vmem:[%s1273_s17 + $0x84] ss:$8 sps:$4 sm:$0xff]   ;;  %v1077_v35 = vld [vmem:[%s1273_s17 + $0x80] ss:$8 sps:$4 sm:$0xff]  }
  0x46   : > { %549 = vmatprep.subr.bf16.mxu0 %v1039_v9  ;;  %v1078_v36 = vld [vmem:[%s1271_s15] ss:$8 sps:$4 sm:$0xff]   ;;  %p898_p6 = scmp.ne.s32.totalorder %s1157_s21, 2 }
  0x47   : > { %v335_v37 = vld [vmem:[#allocation2 + $0x10] sm:$0xff]  ;;  %v336_v39 = vld [vmem:[#allocation2] sm:$0xff]  ;;  %v337_v42 = vld [vmem:[#allocation2 + $0x18] sm:$0xff] }
  0x48   : > { %v338_v45 = vld [vmem:[#allocation2 + $0x8] sm:$0xff] }
  0x49   : > { %550 = vmatpush1.bf16.msra.mxu0 %v1041_v10 }
  0x4a   : > { %551 = vmatprep.subr.bf16.mxu0 %v1042_v11 }
  0x4d   : > { %552 = vmatpush1.bf16.msra.mxu0 %v1044_v12 }
  0x4e   : > { %553 = vmatprep.subr.bf16.mxu0 %v1045_v13 }
  0x51   : > { %554 = vmatpush1.bf16.msra.mxu0 %v1047_v14 }
  0x52   : > { %555 = vmatprep.subr.bf16.mxu0 %v1048_v15 }
  0x55   : > { %556 = vmatpush1.bf16.msra.mxu0 %v1050_v17 }
  0x56   : > { %557 = vmatprep.subr.bf16.mxu0 %v1051_v18 }
  0x59   : > { %558 = vmatpush1.bf16.msra.mxu0 %v1053_v19 }
  0x5a   : > { %559 = vmatprep.subr.bf16.mxu0 %v1054_v20 }
  0x5d   : > { %560 = vmatpush2.bf16.msra.mxu0 %v1056_v21 }
  0x5e   : > { %561 = vmatprep.subr.bf16.mxu0 %v1057_v22 }
  0x61   : > { %562 = vmatpush2.bf16.msra.mxu0 %v1059_v23 }
  0x62   : > { %563 = vmatprep.subr.bf16.mxu0 %v1060_v24 }
  0x65   : > { %564 = vmatpush2.bf16.msra.mxu0 %v1062_v25 }
  0x66   : > { %565 = vmatprep.subr.bf16.mxu0 %v1063_v26 }
  0x69   : > { %566 = vmatpush2.bf16.msra.mxu0 %v1065_v27 }
  0x6a   : > { %567 = vmatprep.subr.bf16.mxu0 %v1066_v28 }
  0x6d   : > { %568 = vmatpush2.bf16.msra.mxu0 %v1068_v29 }
  0x6e   : > { %569 = vmatprep.subr.bf16.mxu0 %v1069_v30 }
  0x71   : > { %570 = vmatpush2.bf16.msra.mxu0 %v1071_v31 }
  0x72   : > { %571 = vmatprep.subr.bf16.mxu0 %v1072_v32 }
  0x75   : > { %572 = vmatpush2.bf16.msra.mxu0 %v1074_v33 }
  0x76   : > { %573 = vmatprep.subr.bf16.mxu0 %v1075_v34 }
  0x79   : > { %574 = vmatpush2.bf16.msra.mxu0 %v1077_v35 }
  0x7c   : > { %576 = vmatmul.mubr.bf16.vlgmr.msra.gmra.mxu0 %v1078_v36 }
 0x13c   : > { %v577_v38 = vpop.f32.mrf.mxu0 }
 0x13d   : > { %v586_v40 = vadd.f32 %v577_v38, %v335_v37 }
 0x13e   : > { %v579_v41 = vpop.f32.mrf.mxu0 }
 0x13f   : > { %590 = vst [vmem:[#allocation2 + $0x10] sm:$0xff] %v586_v40  ;;  %v587_v43 = vadd.f32 %v579_v41, %v336_v39 }
 0x140   : > { %v581_v44 = vpop.f32.mrf.mxu0 }
 0x141   : > { %591 = vst [vmem:[#allocation2] sm:$0xff] %v587_v43  ;;  %v588_v46 = vadd.f32 %v581_v44, %v337_v42  ;;  %597 = sbr.rel (%p898_p6) target bundleno = 873 (0x369), region = 90 }
 0x142   : > { %v583_v47 = vpop.f32.mrf.mxu0 }
 0x143   : > { %592 = vst [vmem:[#allocation2 + $0x18] sm:$0xff] %v588_v46  ;;  %v589_v48 = vadd.f32 %v583_v47, %v338_v45 }
 0x145   : > { %593 = vst [vmem:[#allocation2 + $0x8] sm:$0xff] %v589_v48 }
 0x146   : > { %v653_v49 = vld [vmem:[%s1444_s3 + $0xf8] sm:$0xff]  ;;  %v652_v51 = vld [vmem:[%s1444_s3 + $0xf0] sm:$0xff]  ;;  %v651_v53 = vld [vmem:[%s1444_s3 + $0xe8] sm:$0xff]  ;;  %v604_v59 = vlaneseq }
 0x147   : > { %v637_v50 = vld [vmem:[%s1444_s3 + $0x78] sm:$0xff]  ;;  %907 = vmatprep.subr.mxu0 %v653_v49  ;;  %945 = vmatprep.subr.mxu1 %v653_v49  ;;  %v636_v52 = vld [vmem:[%s1444_s3 + $0x70] sm:$0xff]  ;;  %v635_v54 = vld [vmem:[%s1444_s3 + $0x68] sm:$0xff] }
 0x148   : > { %908 = vmatpush3.msra.mxu0 %v637_v50  ;;  %961 = vmatpush3.msra.mxu1 %v637_v50  ;;  %v650_v55 = vld [vmem:[%s1444_s3 + $0xe0] sm:$0xff]  ;;  %v649_v57 = vld [vmem:[%s1444_s3 + $0xd8] sm:$0xff]  ;;  %v648_v60 = vld [vmem:[%s1444_s3 + $0xd0] sm:$0xff]  ;;  %v605_v0 = vshrl.u32 %v604_v59, 7 }
 0x149   : > { %909 = vmatprep.subr.mxu0 %v652_v51  ;;  %946 = vmatprep.subr.mxu1 %v652_v51  ;;  %v634_v56 = vld [vmem:[%s1444_s3 + $0x60] sm:$0xff]  ;;  %v633_v58 = vld [vmem:[%s1444_s3 + $0x58] sm:$0xff]  ;;  %v632_v61 = vld [vmem:[%s1444_s3 + $0x50] sm:$0xff] }
 0x14a   : > { %910 = vmatpush3.msra.mxu0 %v636_v52  ;;  %962 = vmatpush3.msra.mxu1 %v636_v52  ;;  %v647_v62 = vld [vmem:[%s1444_s3 + $0xc8] sm:$0xff]  ;;  %v646_v1 = vld [vmem:[%s1444_s3 + $0xc0] sm:$0xff]  ;;  %v645_v3 = vld [vmem:[%s1444_s3 + $0xb8] sm:$0xff]  ;;  %v610_v5 = vsub.s32 1, %v605_v0  ;;  %v606_v9 = vsub.s32 0, %v605_v0 }
 0x14b   : > { %911 = vmatprep.subr.mxu0 %v651_v53  ;;  %947 = vmatprep.subr.mxu1 %v651_v53  ;;  %v631_v63 = vld [vmem:[%s1444_s3 + $0x48] sm:$0xff]  ;;  %v630_v2 = vld [vmem:[%s1444_s3 + $0x40] sm:$0xff]  ;;  %v629_v4 = vld [vmem:[%s1444_s3 + $0x38] sm:$0xff] }
 0x14c   : > { %912 = vmatpush3.msra.mxu0 %v635_v54  ;;  %963 = vmatpush3.msra.mxu1 %v635_v54  ;;  %v644_v6 = vld [vmem:[%s1444_s3 + $0xb0] sm:$0xff]  ;;  %v602_v7 = vld [vmem:[%s1443_s2] sm:$0x3]  ;;  %v643_v10 = vld [vmem:[%s1444_s3 + $0xa8] sm:$0xff] }
 0x14d   : > { %913 = vmatprep.subr.mxu0 %v650_v55  ;;  %948 = vmatprep.subr.mxu1 %v650_v55  ;;  %v628_v8 = vld [vmem:[%s1444_s3 + $0x30] sm:$0xff]  ;;  %v627_v11 = vld [vmem:[%s1444_s3 + $0x28] sm:$0xff]  ;;  %v611_v12 = vrot.slane %v602_v7, %v610_v5  ;;  %v642_v13 = vld [vmem:[%s1444_s3 + $0xa0] sm:$0xff]  ;;  %v607_v16 = vrot.slane %v602_v7, %v606_v9 }
 0x14e   : > { %914 = vmatpush3.msra.mxu0 %v634_v56  ;;  %964 = vmatpush3.msra.mxu1 %v634_v56  ;;  %v599_v14 = vld [vmem:[#allocation2] sm:$0xff]  ;;  %v641_v17 = vld [vmem:[%s1444_s3 + $0x98] sm:$0xff]  ;;  %v598_v18 = vld [vmem:[#allocation2 + $0x10] sm:$0xff] }
 0x14f   : > { %915 = vmatprep.subr.mxu0 %v649_v57  ;;  %949 = vmatprep.subr.mxu1 %v649_v57  ;;  %v626_v15 = vld [vmem:[%s1444_s3 + $0x20] sm:$0xff]  ;;  %v625_v19 = vld [vmem:[%s1444_s3 + $0x18] sm:$0xff]  ;;  %v615_v20 = vadd.f32 %v611_v12, %v599_v14  ;;  %v601_v21 = vld [vmem:[#allocation2 + $0x8] sm:$0xff]  ;;  %v614_v25 = vadd.f32 %v607_v16, %v598_v18 }
 0x150   : > { %916 = vmatpush3.msra.mxu0 %v633_v58  ;;  %965 = vmatpush3.msra.mxu1 %v633_v58  ;;  %v640_v22 = vld [vmem:[%s1444_s3 + $0x90] sm:$0xff]  ;;  %v600_v23 = vld [vmem:[#allocation2 + $0x18] sm:$0xff]  ;;  %v639_v26 = vld [vmem:[%s1444_s3 + $0x88] sm:$0xff]  ;;  %v617_v27 = vadd.f32 %v611_v12, %v601_v21 }
 0x151   : > { %917 = vmatprep.subr.mxu0 %v648_v60  ;;  %950 = vmatprep.subr.mxu1 %v648_v60  ;;  %v624_v24 = vld [vmem:[%s1444_s3 + $0x10] sm:$0xff]  ;;  %v623_v28 = vld [vmem:[%s1444_s3 + $0x8] sm:$0xff]  ;;  %v619_v29 = vmax.f32 %v615_v20, 0.0  ;;  %v616_v30 = vadd.f32 %v607_v16, %v600_v23  ;;  %v638_v31 = vld [vmem:[%s1444_s3 + $0x80] sm:$0xff]  ;;  %v618_v33 = vmax.f32 %v614_v25, 0.0 }
 0x152   : > { %918 = vmatpush3.msra.mxu0 %v632_v61  ;;  %966 = vmatpush3.msra.mxu1 %v632_v61  ;;  %v622_v32 = vld [vmem:[%s1444_s3] sm:$0xff]  ;;  %v621_v34 = vmax.f32 %v617_v27, 0.0 }
 0x153   : > { %919 = vmatprep.subr.mxu0 %v647_v62  ;;  %951 = vmatprep.subr.mxu1 %v647_v62  ;;  %v620_v35 = vmax.f32 %v616_v30, 0.0  ;;  %v899_v39 = vld [vmem:[%s1445_s4] ss:$0 sm:$0xff] }
 0x154   : > { %920 = vmatpush3.msra.mxu0 %v631_v63  ;;  %967 = vmatpush3.msra.mxu1 %v631_v63 }
 0x155   : > { %921 = vmatprep.subr.mxu0 %v646_v1  ;;  %952 = vmatprep.subr.mxu1 %v646_v1 }
 0x156   : > { %922 = vmatpush3.msra.mxu0 %v630_v2  ;;  %968 = vmatpush3.msra.mxu1 %v630_v2 }
 0x157   : > { %923 = vmatprep.subr.mxu0 %v645_v3  ;;  %953 = vmatprep.subr.mxu1 %v645_v3 }
 0x158   : > { %924 = vmatpush3.msra.mxu0 %v629_v4  ;;  %969 = vmatpush3.msra.mxu1 %v629_v4 }
 0x159   : > { %925 = vmatprep.subr.mxu0 %v644_v6  ;;  %954 = vmatprep.subr.mxu1 %v644_v6 }
 0x15a   : > { %926 = vmatpush3.msra.mxu0 %v628_v8  ;;  %970 = vmatpush3.msra.mxu1 %v628_v8 }
 0x15b   : > { %927 = vmatprep.subr.mxu0 %v643_v10  ;;  %955 = vmatprep.subr.mxu1 %v643_v10 }
 0x15c   : > { %928 = vmatpush3.msra.mxu0 %v627_v11  ;;  %971 = vmatpush3.msra.mxu1 %v627_v11 }
 0x15d   : > { %929 = vmatprep.subr.mxu0 %v642_v13  ;;  %956 = vmatprep.subr.mxu1 %v642_v13 }
 0x15e   : > { %930 = vmatpush3.msra.mxu0 %v626_v15  ;;  %972 = vmatpush3.msra.mxu1 %v626_v15 }
 0x15f   : > { %931 = vmatprep.subr.mxu0 %v641_v17  ;;  %957 = vmatprep.subr.mxu1 %v641_v17 }
 0x160   : > { %932 = vmatpush3.msra.mxu0 %v625_v19  ;;  %973 = vmatpush3.msra.mxu1 %v625_v19 }
 0x161   : > { %933 = vmatprep.subr.mxu0 %v640_v22  ;;  %958 = vmatprep.subr.mxu1 %v640_v22 }
 0x162   : > { %934 = vmatpush3.msra.mxu0 %v624_v24  ;;  %974 = vmatpush3.msra.mxu1 %v624_v24 }
 0x163   : > { %935 = vmatprep.subr.mxu0 %v639_v26  ;;  %959 = vmatprep.subr.mxu1 %v639_v26 }
 0x164   : > { %936 = vmatpush3.msra.mxu0 %v623_v28  ;;  %975 = vmatpush3.msra.mxu1 %v623_v28 }
 0x165   : > { %937 = vmatprep.subr.mxu0 %v638_v31  ;;  %725 = vmatprep.mubr.f32.mxu0 %v619_v29 }
 0x166   : > { %938 = vmatpush3.msra.mxu0 %v622_v32  ;;  %960 = vmatprep.subr.mxu1 %v638_v31 }
 0x167   : > { %726 = vmatmul.mubr.f32.vlgmr.msra.gmra.mxu0 %v618_v33  ;;  %976 = vmatpush3.msra.mxu1 %v622_v32 }
 0x168   : > { %730 = vmatprep.mubr.f32.mxu1 %v621_v34 }
 0x169   : > { %731 = vmatmul.mubr.f32.vlgmr.msra.gmra.mxu1 %v620_v35 }
 0x227   : > { %v939_v36 = vpop.f32.mrf.mxu0 }
 0x229   : > { %v940_v37 = vpop.f32.mrf.mxu0  ;;  %v942_v38 = vpop.f32.mrf.mxu1 }
 0x22a   : > { %v941_v40 = vadd.f32 %v940_v37, %v939_v36 }
 0x22b   : > { %v943_v41 = vpop.f32.mrf.mxu1 }
 0x22c   : > { %v944_v42 = vadd.f32 %v943_v41, %v942_v38  ;;  %v728_v43 = vadd.f32 %v941_v40, %v899_v39 }
 0x22e   : > { %736 = vmax.xlane.f32.xlu0 %v728_v43  ;;  %v733_v44 = vadd.f32 %v944_v42, %v899_v39 }
 0x232   : > { %738 = vmax.xlane.f32.xlu0 %v733_v44 }
 0x2b7   : > { %v737_v45 = vpop.xlane.xlu0 %736 }
 0x2b8   : > { %v740_v46 = vsub.f32 %v728_v43, %v737_v45 }
 0x2ba   : > { %v742_v47 = vmul.f32 1.442695, %v740_v46 }
 0x2bb   : > { %v739_v48 = vpop.xlane.xlu0 %738 }
 0x2bc   : > { %1081 = vpow2.f32 %v742_v47  ;;  %v741_v49 = vsub.f32 %v733_v44, %v739_v48 }
 0x2be   : > { %v744_v50 = vmul.f32 1.442695, %v741_v49 }
 0x2c0   : > { %1083 = vpow2.f32 %v744_v50 }
 0x2c9   : > { %v1082_v51 = vpop.eup %1081 }
 0x2ca   : > { %746 = vadd.xlane.f32.xlu1 %v1082_v51 }
 0x2cd   : > { %v1084_v52 = vpop.eup %1083 }
 0x2ce   : > { %748 = vadd.xlane.f32.xlu1 %v1084_v52 }
 0x353   : > { %v747_v53 = vpop.xlane.xlu1 %746 }
 0x354   : > { %1085 = vrcp.f32 %v747_v53 }
 0x357   : > { %v749_v54 = vpop.xlane.xlu1 %748 }
 0x358   : > { %1087 = vrcp.f32 %v749_v54 }
 0x361   : > { %v1086_v55 = vpop.eup %1085 }
 0x362   : > { %v752_v56 = vmul.f32 %v1086_v55, %v1082_v51 }
 0x364   : > { %754 = vst [vmem:[%s1446_s5] sm:$0xff] %v752_v56 }
 0x365   : > { %v1088_v57 = vpop.eup %1087 }
 0x366   : > { %v753_v58 = vmul.f32 %v1088_v57, %v1084_v52 }
 0x368   : > { %755 = vst [vmem:[%s1446_s5 + $0x8] sm:$0xff] %v753_v58 }
 0x369 PF: > { %s18_s23 = sadd.s32 1, %s1165_s23   ;;  %s1449_s18 = smov %s1149_s19 }
 0x36a   : > { %p15_p7 = scmp.ge.s32.totalorder %s18_s23, 5   ;;  %s1450_s19 = smov %s1153_s20 }
 0x36b   : > { %s1451_s20 = smov %s1249_s30  ;;  %s1452_s21 = smov %s1161_s22 }
 0x36c   : > { %s1453_s22 = smov %s1455_s25  ;;  %17 = sbr.rel (!%p15_p7) target bundleno = 4 (0x4), region = 134 }
 0x371   :  { %778 = vsyncpa [#allocation5], 1 }
 0x372   :  { %780 = vsyncpa [#allocation5 + $0x1], 1 }

</bundles_post_ra>
